<compile_context>
chip_gen: v7x
topology: tpu7x:2x2x1
jax: 0.10.0
libtpu: 0.0.40
codegen_flags: <defaults>
</compile_context>

<pallas_src>
import functools

import jax
import jax.numpy as jnp
from jax.experimental import pallas as pl
from jax.experimental.pallas import tpu as pltpu


# ------------------------------ small helpers -------------------------------

def _round_up(x, m):
    return ((x + m - 1) // m) * m


def etype_key(etype):
    src, rel, dst = etype
    return src + "-" + rel + "-" + dst


def _derive_vmem_limit(tm, tk, d, n_k, yht_resident):
    """Approximate VMEM footprint of the pipelined kernel -> vmem_limit_bytes."""
    a_tile = tk * tm                                   # int8 adjacency tile
    yht_bytes = (n_k if yht_resident else 1) * d * tk * 2
    col_tiles = (3 * d * tm + tm) * 4                  # yt, xt, out tiles + coef row
    per_buffer = a_tile + yht_bytes + col_tiles
    conv_tmp = tk * tm * (4 + 2)                       # in-kernel i8->f32->bf16 temporaries
    acc = d * tm * 4
    need = 2 * per_buffer + conv_tmp + acc             # double-buffered pipeline
    return int(min(max(2 * need, 16 * 1024 * 1024), 48 * 1024 * 1024))


# ----------------------------- Pallas kernel ---------------------------------

def _fused_dst_kernel(yht_ref, a_ref, yt_ref, xt_ref, coef_ref, out_ref, acc_ref,
                      *, alp, lam, yht_resident):
    """Grid point (i = dst tile, k = src tile), transposed layout:
         accT (d, tm) += YH^T[:, k-tile] @ A[k-tile, i-tile]     (bf16 x bf16 -> f32)
       epilogue (k == last):
         Y'^T = coef * Y^T + alp * X^T + alp*lam * accT
    """
    k = pl.program_id(1)

    @pl.when(k == 0)
    def _init():
        acc_ref[...] = jnp.zeros_like(acc_ref)

    # int8 (exact 0/1) adjacency tile -> bf16 for the MXU (two-step cast: always lowers).
    a_bf = a_ref[...].astype(jnp.float32).astype(jnp.bfloat16)
    yht = yht_ref[k] if yht_resident else yht_ref[0]          # (d, tk) bf16
    acc_ref[...] += jnp.dot(yht, a_bf, preferred_element_type=jnp.float32)

    @pl.when(k == pl.num_programs(1) - 1)
    def _finalize():
        out_ref[...] = (coef_ref[...] * yt_ref[...]
                        + alp * xt_ref[...]
                        + (alp * lam) * acc_ref[...]).astype(out_ref.dtype)


# ----------------------------- Pallas wrapper ---------------------------------

def fused_dst_step(yht_tiles, a_cat, yt, xt, coef_t, *, alp, lam, tm, tk,
                   yht_resident, vmem_limit):
    """One prop step for one destination node type (all contributing etypes fused)."""
    n_k, d, _ = yht_tiles.shape              # (n_k, d, tk) bf16 message tiles
    s_pad, n_dst_pad = a_cat.shape            # (s_pad, n_dst_pad) int8 adjacency
    grid = (n_dst_pad // tm, n_k)

    if yht_resident:
        yht_spec = pl.BlockSpec((n_k, d, tk), lambda i, k: (0, 0, 0))   # VMEM-resident
    else:
        yht_spec = pl.BlockSpec((1, d, tk), lambda i, k: (k, 0, 0))     # streamed

    flops = int(2 * d * s_pad * n_dst_pad + 6 * d * n_dst_pad)
    bytes_accessed = int(a_cat.size
                         + (yht_tiles.size * 2 if yht_resident
                            else grid[0] * yht_tiles.size * 2)
                         + (yt.size + xt.size + coef_t.size + d * n_dst_pad) * 4)

    kernel = functools.partial(_fused_dst_kernel, alp=float(alp), lam=float(lam),
                               yht_resident=yht_resident)
    return pl.pallas_call(
        kernel,
        out_shape=jax.ShapeDtypeStruct((d, n_dst_pad), jnp.float32),
        grid_spec=pltpu.PrefetchScalarGridSpec(
            num_scalar_prefetch=0,
            grid=grid,
            in_specs=[
                yht_spec,                                          # (Y_src H)^T, bf16
                pl.BlockSpec((tk, tm), lambda i, k: (k, i)),       # A tile, int8
                pl.BlockSpec((d, tm), lambda i, k: (0, i)),        # Y^T dst tile, f32
                pl.BlockSpec((d, tm), lambda i, k: (0, i)),        # X^T dst tile, f32
                pl.BlockSpec((1, tm), lambda i, k: (0, i)),        # coef row, f32
            ],
            out_specs=pl.BlockSpec((d, tm), lambda i, k: (0, i)),
            scratch_shapes=[pltpu.VMEM((d, tm), jnp.float32)],
        ),
        compiler_params=pltpu.CompilerParams(
            dimension_semantics=("parallel", "arbitrary"),
            vmem_limit_bytes=int(vmem_limit),
        ),
        cost_estimate=pl.CostEstimate(flops=flops, transcendentals=0,
                                      bytes_accessed=bytes_accessed),
    )(yht_tiles, a_cat, yt, xt, coef_t)


# ------------------------------ module glue ----------------------------------

class Config:
    alp = 0.0            # <= 0  ->  alp = 1 / (lam + 1)
    lam = 1.0
    prop_step = 4
    no_train_H = False
    residual = True
    multicategory = False


def init_H(key, d, canonical_etypes, residual):
    """Deterministic re-implementation of the module's H parameter init."""
    H = {}
    for i, etype in enumerate(canonical_etypes):
        t = etype_key(etype)
        k = jax.random.fold_in(key, i)
        bound = (1.0 / d) if residual else (4.0 / d)
        h = jax.random.normal(k, (d, d), dtype=jnp.float32) * bound
        if residual:
            h = h + jnp.eye(d, dtype=jnp.float32)
        H[t] = h
    return H


def hetero_unfolding_forward(adj_T, X, H, C, ntypes, canonical_etypes, etypes_inv,
                             *, tm=512, tk=1024):
    """adj_T[t]: dense (N_dst, N_src) 0/1 adjacency (already transposed), f32.
    X[ntype]:  (N_ntype, d) node features.  Returns Y with the same structure."""
    del etypes_inv  # not needed for the forward update
    alp = C.alp if C.alp > 0 else 1.0 / (C.lam + 1.0)
    lam = C.lam

    num_nodes = {n: X[n].shape[0] for n in ntypes}

    # deg[src] += out_degrees(etype), exactly as the torch forward() does.
    deg = {n: jnp.zeros((num_nodes[n], 1), jnp.float32) for n in ntypes}
    for e in canonical_etypes:
        deg[e[0]] = deg[e[0]] + jnp.sum(adj_T[etype_key(e)], axis=0).reshape(-1, 1)
    coef = {n: 1.0 - alp * (1.0 + lam * deg[n]) for n in ntypes}

    # Step-invariant, per-dst-ntype operands (built once, outside the prop loop).
    per_dst = {}
    for n in ntypes:
        etypes_n = [e for e in canonical_etypes if e[2] == n]
        if not etypes_n:
            per_dst[n] = None
            continue
        d = X[n].shape[1]
        n_dst = num_nodes[n]

        tm_eff = min(tm, _round_up(n_dst, 128))
        n_dst_pad = _round_up(n_dst, tm_eff)
        if n_dst_pad // tm_eff < 2 and tm_eff > 128:
            # give the "parallel" dst axis >= 2 tiles so v7x dual-TC is not idle
            tm_eff = _round_up(tm_eff // 2, 128)
            n_dst_pad = _round_up(n_dst, tm_eff)

        src_sizes = [num_nodes[e[0]] for e in etypes_n]
        s_total = sum(src_sizes)
        tk_eff = min(tk, _round_up(s_total, 128))
        s_pad = _round_up(s_total, tk_eff)
        n_k = s_pad // tk_eff

        # A_cat: per-etype (N_src, N_dst) adjacency stacked along src, int8 (0/1 exact).
        a_blocks = [adj_T[etype_key(e)].T for e in etypes_n]
        a_cat = jnp.concatenate(a_blocks, axis=0)
        a_cat = jnp.pad(a_cat, ((0, s_pad - s_total), (0, n_dst_pad - n_dst)))
        a_cat = a_cat.astype(jnp.int8)

        xt = jnp.pad(X[n].astype(jnp.float32).T, ((0, 0), (0, n_dst_pad - n_dst)))
        coef_t = jnp.pad(coef[n].reshape(1, -1), ((0, 0), (0, n_dst_pad - n_dst)))

        yht_resident = (s_pad * d * 2) <= 4 * 1024 * 1024     # keep YH in VMEM if small
        vmem_limit = _derive_vmem_limit(tm_eff, tk_eff, d, n_k, yht_resident)

        per_dst[n] = dict(etypes=etypes_n, tm=tm_eff, tk=tk_eff, n_k=n_k,
                          n_dst_pad=n_dst_pad, s_pad=s_pad, s_total=s_total,
                          a_cat=a_cat, xt=xt, coef_t=coef_t,
                          yht_resident=yht_resident, vmem_limit=vmem_limit)

    Y = {n: X[n].astype(jnp.float32) for n in ntypes}
    for _ in range(C.prop_step):
        Y_new = {}
        for n in ntypes:
            info = per_dst[n]
            if info is None:
                # No incoming etype: pure elementwise update, let XLA fuse it.
                Y_new[n] = coef[n] * Y[n] + alp * X[n].astype(jnp.float32)
                continue
            d = X[n].shape[1]
            # Pre-apply H to the source features (cheap); quantize messages to bf16.
            yht_parts = [jnp.dot(Y[e[0]], H[etype_key(e)]).T for e in info["etypes"]]
            yht = jnp.concatenate(yht_parts, axis=1)                    # (d, s_total) f32
            yht = jnp.pad(yht, ((0, 0), (0, info["s_pad"] - info["s_total"])))
            yht = yht.astype(jnp.bfloat16)
            yht_tiles = yht.reshape(d, info["n_k"], info["tk"]).transpose(1, 0, 2)
            yt = jnp.pad(Y[n].T, ((0, 0), (0, info["n_dst_pad"] - num_nodes[n])))

            out_t = fused_dst_step(yht_tiles, info["a_cat"], yt, info["xt"],
                                   info["coef_t"], alp=alp, lam=lam,
                                   tm=info["tm"], tk=info["tk"],
                                   yht_resident=info["yht_resident"],
                                   vmem_limit=info["vmem_limit"])
            Y_new[n] = out_t[:, :num_nodes[n]].T
        Y = Y_new
    return Y


# ------------------------------ pure-JAX reference ---------------------------

def reference_forward(adj_T, X, H, C, ntypes, canonical_etypes):
    alp = C.alp if C.alp > 0 else 1.0 / (C.lam + 1.0)
    lam = C.lam
    deg = {n: jnp.zeros((X[n].shape[0], 1), jnp.float32) for n in ntypes}
    for e in canonical_etypes:
        deg[e[0]] = deg[e[0]] + jnp.sum(adj_T[etype_key(e)], axis=0).reshape(-1, 1)
    coef = {n: 1.0 - alp * (1.0 + lam * deg[n]) for n in ntypes}
    Y = {n: X[n].astype(jnp.float32) for n in ntypes}
    for _ in range(C.prop_step):
        agg = {n: jnp.zeros_like(Y[n]) for n in ntypes}
        for e in canonical_etypes:
            src, _, dst = e
            t = etype_key(e)
            msg = jnp.dot(Y[src], H[t])                              # same op as the wrapper
            msg = msg.astype(jnp.bfloat16).astype(jnp.float32)       # kernel feeds bf16 messages
            agg[dst] = agg[dst] + jnp.dot(adj_T[t], msg)
        Y = {n: coef[n] * Y[n] + alp * X[n] + (alp * lam) * agg[n] for n in ntypes}
    return Y


# --------------------------------- main ---------------------------------------

if __name__ == "__main__":
    key = jax.random.PRNGKey(0)
    d = 32
    ntypes = ["user", "item"]
    num_nodes = {"user": 16, "item": 24}
    canonical_etypes = [("user", "rates", "item"), ("item", "rated_by", "user")]
    etypes_inv = {
        "user-rates-item": "item-rated_by-user",
        "item-rated_by-user": "user-rates-item",
    }
    C = Config()

    k_adj, k_xu, k_xi, k_h = jax.random.split(key, 4)

    # base edges user -> item, plus explicit reverse etype (item -> user)
    A = (jax.random.uniform(k_adj, (num_nodes["user"], num_nodes["item"])) < 0.3
         ).astype(jnp.float32)                      # (N_user, N_item)
    adj_T = {
        "user-rates-item": A.T,                     # (N_dst=item, N_src=user)
        "item-rated_by-user": A,                    # (N_dst=user, N_src=item)
    }

    X = {
        "user": jax.random.normal(k_xu, (num_nodes["user"], d), dtype=jnp.float32),
        "item": jax.random.normal(k_xi, (num_nodes["item"], d), dtype=jnp.float32),
    }

    H = init_H(k_h, d, canonical_etypes, residual=C.residual)

    Y = hetero_unfolding_forward(adj_T, X, H, C, ntypes, canonical_etypes, etypes_inv)
    Y = jax.block_until_ready(Y)

    # shape / dtype sanity
    assert Y["user"].shape == (num_nodes["user"], d) and Y["user"].dtype == jnp.float32
    assert Y["item"].shape == (num_nodes["item"], d) and Y["item"].dtype == jnp.float32

    # numerics vs. pure-JAX reference (same bf16 message quantization as the kernel);
    # tolerance is relative to the result scale since the unfolding iteration amplifies.
    Y_ref = jax.block_until_ready(
        reference_forward(adj_T, X, H, C, ntypes, canonical_etypes))
    for n in ntypes:
        scale = max(1.0, float(jnp.max(jnp.abs(Y_ref[n]))))
        err = float(jnp.max(jnp.abs(Y[n] - Y_ref[n])))
        assert err <= 1e-2 * scale, (n, err, scale)

    print("KERNEL_OK")
</pallas_src>

<mosaic_0001>
module attributes {stable_mosaic.version = 11 : i64} {
  func.func @_fused_dst_kernel(%arg0: i32, %arg1: i32, %arg2: memref<1x32x128xbf16, #tpu.memory_space<vmem>>, %arg3: memref<128x128xi8, #tpu.memory_space<vmem>>, %arg4: memref<32x128xf32, #tpu.memory_space<vmem>>, %arg5: memref<32x128xf32, #tpu.memory_space<vmem>>, %arg6: memref<1x128xf32, #tpu.memory_space<vmem>>, %arg7: memref<32x128xf32, #tpu.memory_space<vmem>>, %arg8: memref<32x128xf32, #tpu.memory_space<vmem>>) attributes {dimension_semantics = [#tpu.dimension_semantics<parallel>, #tpu.dimension_semantics<arbitrary>], iteration_bounds = array<i64: 1, 1>, scalar_prefetch = 0 : i64, scratch_operands = 1 : i64, tpu.core_type = #tpu.core_type<tc>, window_params = [{pipeline_mode = #tpu.pipeline_mode<synchronous>, transform_indices = @transform_0, window_bounds = array<i64: 1, 32, 128>}, {transform_indices = @transform_1, window_bounds = array<i64: 128, 128>}, {transform_indices = @transform_2, window_bounds = array<i64: 32, 128>}, {transform_indices = @transform_3, window_bounds = array<i64: 32, 128>}, {transform_indices = @transform_4, window_bounds = array<i64: 1, 128>}, {transform_indices = @transform_5, window_bounds = array<i64: 32, 128>}]} {
    %c0_i32 = arith.constant 0 : i32
    %0 = arith.cmpi eq, %arg1, %c0_i32 : i32
    %1 = arith.extui %0 : i1 to i32
    %c0_i32_0 = arith.constant 0 : i32
    %2 = arith.cmpi ne, %1, %c0_i32_0 : i32
    scf.if %2 {
      %cst_10 = arith.constant 0.000000e+00 : f32
      %16 = vector.broadcast %cst_10 : f32 to vector<32x128xf32>
      %c0_11 = arith.constant 0 : index
      %c0_12 = arith.constant 0 : index
      %17 = vector.load %arg8[%c0_11, %c0_12] : memref<32x128xf32, #tpu.memory_space<vmem>>, vector<32x128xf32>
      tpu.vector_store %arg8[%c0_11, %c0_12], %16 {strides = array<i32>} : memref<32x128xf32, #tpu.memory_space<vmem>>, vector<32x128xf32>,
    } else {
    }
    %c0 = arith.constant 0 : index
    %c0_1 = arith.constant 0 : index
    %3 = vector.load %arg3[%c0, %c0_1] : memref<128x128xi8, #tpu.memory_space<vmem>>, vector<128x128xi8>
    %4 = arith.sitofp %3 : vector<128x128xi8> to vector<128x128xf32>
    %5 = arith.truncf %4 : vector<128x128xf32> to vector<128x128xbf16>
    %6 = arith.index_cast %arg1 : i32 to index
    %c0_2 = arith.constant 0 : index
    %c0_3 = arith.constant 0 : index
    %7 = vector.load %arg2[%6, %c0_2, %c0_3] : memref<1x32x128xbf16, #tpu.memory_space<vmem>>, vector<1x32x128xbf16>
    %8 = vector.shape_cast %7 : vector<1x32x128xbf16> to vector<32x128xbf16>
    %c0_4 = arith.constant 0 : index
    %c0_5 = arith.constant 0 : index
    %9 = vector.load %arg8[%c0_4, %c0_5] : memref<32x128xf32, #tpu.memory_space<vmem>>, vector<32x128xf32>
    %cst = arith.constant dense<0.000000e+00> : vector<32x128xf32>
    %10 = tpu.matmul %8, %5, %cst {dimension_numbers = #tpu.dot_dimension_numbers<[1], [0], [0], [1], [0, 0, 1, 1], [], []>} : vector<32x128xbf16>, vector<128x128xbf16>, vector<32x128xf32> -> vector<32x128xf32>
    %11 = arith.addf %9, %10 : vector<32x128xf32>
    %c0_6 = arith.constant 0 : index
    %c0_7 = arith.constant 0 : index
    %12 = vector.load %arg8[%c0_6, %c0_7] : memref<32x128xf32, #tpu.memory_space<vmem>>, vector<32x128xf32>
    tpu.vector_store %arg8[%c0_6, %c0_7], %11 {strides = array<i32>} : memref<32x128xf32, #tpu.memory_space<vmem>>, vector<32x128xf32>,
    %c0_i32_8 = arith.constant 0 : i32
    %13 = arith.cmpi eq, %arg1, %c0_i32_8 : i32
    %14 = arith.extui %13 : i1 to i32
    %c0_i32_9 = arith.constant 0 : i32
    %15 = arith.cmpi ne, %14, %c0_i32_9 : i32
    scf.if %15 {
      %c0_10 = arith.constant 0 : index
      %c0_11 = arith.constant 0 : index
      %16 = vector.load %arg6[%c0_10, %c0_11] : memref<1x128xf32, #tpu.memory_space<vmem>>, vector<1x128xf32>
      %c0_12 = arith.constant 0 : index
      %c0_13 = arith.constant 0 : index
      %17 = vector.load %arg4[%c0_12, %c0_13] : memref<32x128xf32, #tpu.memory_space<vmem>>, vector<32x128xf32>
      %18 = vector.broadcast %16 : vector<1x128xf32> to vector<32x128xf32>
      %19 = arith.mulf %18, %17 : vector<32x128xf32>
      %c0_14 = arith.constant 0 : index
      %c0_15 = arith.constant 0 : index
      %20 = vector.load %arg5[%c0_14, %c0_15] : memref<32x128xf32, #tpu.memory_space<vmem>>, vector<32x128xf32>
      %cst_16 = arith.constant 5.000000e-01 : f32
      %21 = vector.broadcast %cst_16 : f32 to vector<32x128xf32>
      %22 = arith.mulf %21, %20 : vector<32x128xf32>
      %23 = arith.addf %19, %22 : vector<32x128xf32>
      %c0_17 = arith.constant 0 : index
      %c0_18 = arith.constant 0 : index
      %24 = vector.load %arg8[%c0_17, %c0_18] : memref<32x128xf32, #tpu.memory_space<vmem>>, vector<32x128xf32>
      %cst_19 = arith.constant 5.000000e-01 : f32
      %25 = vector.broadcast %cst_19 : f32 to vector<32x128xf32>
      %26 = arith.mulf %25, %24 : vector<32x128xf32>
      %27 = arith.addf %23, %26 : vector<32x128xf32>
      %c0_20 = arith.constant 0 : index
      %c0_21 = arith.constant 0 : index
      %28 = vector.load %arg7[%c0_20, %c0_21] : memref<32x128xf32, #tpu.memory_space<vmem>>, vector<32x128xf32>
      tpu.vector_store %arg7[%c0_20, %c0_21], %27 {strides = array<i32>} : memref<32x128xf32, #tpu.memory_space<vmem>>, vector<32x128xf32>,
    } else {
    }
    return
  }
  func.func @transform_0(%arg0: i32, %arg1: i32) -> (i32, i32, i32) {
    %c0_i32 = arith.constant 0 : i32
    %c0_i32_0 = arith.constant 0 : i32
    %c0_i32_1 = arith.constant 0 : i32
    %c0_i32_2 = arith.constant 0 : i32
    return %c0_i32, %c0_i32_0, %c0_i32_1 : i32, i32, i32
  }
  func.func @transform_1(%arg0: i32, %arg1: i32) -> (i32, i32) {
    %c0_i32 = arith.constant 0 : i32
    return %arg1, %arg0 : i32, i32
  }
  func.func @transform_2(%arg0: i32, %arg1: i32) -> (i32, i32) {
    %c0_i32 = arith.constant 0 : i32
    %c0_i32_0 = arith.constant 0 : i32
    return %c0_i32, %arg0 : i32, i32
  }
  func.func @transform_3(%arg0: i32, %arg1: i32) -> (i32, i32) {
    %c0_i32 = arith.constant 0 : i32
    %c0_i32_0 = arith.constant 0 : i32
    return %c0_i32, %arg0 : i32, i32
  }
  func.func @transform_4(%arg0: i32, %arg1: i32) -> (i32, i32) {
    %c0_i32 = arith.constant 0 : i32
    %c0_i32_0 = arith.constant 0 : i32
    return %c0_i32, %arg0 : i32, i32
  }
  func.func @transform_5(%arg0: i32, %arg1: i32) -> (i32, i32) {
    %c0_i32 = arith.constant 0 : i32
    %c0_i32_0 = arith.constant 0 : i32
    return %c0_i32, %arg0 : i32, i32
  }
}

</mosaic_0001>

<bundles_post_ra>
// kernel: tpu_custom_call.1
= control target key start
LH: loop header
LB: loop body
LE: loop exit
PB: predicated region body
PF: predicated region fallthrough
CT: control target
= control target key end

     0   :  { %10 = vsyncpa [#allocation4], 0  ;;  %s525_s0 = inlined_call_operand.hbm [shape: bf16[1,32,128], index: 0, kind: input, shape index: {}]   ;;  %s526_s1 = inlined_call_operand.hbm [shape: s8[128,128], index: 1, kind: input, shape index: {}]   ;;  %s527_s2 = inlined_call_operand.hbm [shape: f32[32,128], index: 2, kind: input, shape index: {}]   ;;  %s528_s3 = inlined_call_operand.hbm [shape: f32[32,128], index: 3, kind: input, shape index: {}]   ;;  %s529_s4 = inlined_call_operand.vmem [shape: f32[1,128], index: 4, kind: input, shape index: {}]   ;;  %s530_s5 = inlined_call_operand.hbm [shape: f32[32,128], index: 5, kind: output, shape index: {}]  }
   0x1   :  { %11 = vsyncpa [#allocation7], 0 }
   0x2   :  { %12 = vsyncpa [#allocation10], 0 }
   0x3   :  { %13 = vsyncpa [#allocation5], 0  ;;  %s404_s18 = smov [#allocation6]   ;;  %s286_s22 = scalar_lea.hbm %s526_s1, 512 }
   0x4   :  { %s31_s19 = sshll.u32 %s404_s18, 4  ;;  %p287_p0 = scmp.ne.s32.totalorder %s526_s1, %s286_s22  ;;  %s32_s19 = int_to_ptr.vmem [resolvable:$true] %s31_s19 }
   0x5   :  { %p290_p1 = scmp.lt.u32.totalorder %s286_s22, %s526_s1 }
   0x7   :  { %p292_p2 = pnand %p290_p1, %p287_p0 }
   0x9   :  { %295 = shalt.err (!%p292_p2)
}
   0xa   :  { %s296_s27 = scalar_lea.vmem %s32_s19, 512  ;;  %p301_p4 = scmp.lt.s32.totalorder %s32_s19, %s32_s19 }
   0xb   :  { %p297_p3 = scmp.ne.s32.totalorder %s32_s19, %s296_s27  ;;  %p302_p5 = scmp.lt.s32.totalorder %s296_s27, %s296_s27 }
   0xd   :  { %p303_p6 = por %p302_p5, %p301_p4 }
   0xf   :  { %p304_p7 = pnand %p303_p6, %p297_p3 }
  0x11   :  { %307 = shalt.err (!%p304_p7)
}
  0x12   :  { %s405_s28 = smov 128   ;;  %s406_s29 = smov 8  }
  0x13   :  { %37 = dma.hbm_to_vmem [thread:$0]  %s526_s1, 512, %s32_s19, [#allocation7], %s405_s28, %s405_s28, %s406_s29  }
  0x14   :  { %s407_s7 = smov [#allocation3]   ;;  %s308_s11 = scalar_lea.hbm %s525_s0, 256 }
  0x15   :  { %s19_s8 = sshll.u32 %s407_s7, 4  ;;  %p309_p8 = scmp.ne.s32.totalorder %s525_s0, %s308_s11  ;;  %s20_s8 = int_to_ptr.vmem [resolvable:$true] %s19_s8 }
  0x16   :  { %p312_p9 = scmp.lt.u32.totalorder %s308_s11, %s525_s0 }
  0x18   :  { %p314_p10 = pnand %p312_p9, %p309_p8 }
  0x1a   :  { %317 = shalt.err (!%p314_p10)
}
  0x1b   :  { %s318_s16 = scalar_lea.vmem %s20_s8, 256  ;;  %p323_p12 = scmp.lt.s32.totalorder %s20_s8, %s20_s8 }
  0x1c   :  { %p319_p11 = scmp.ne.s32.totalorder %s20_s8, %s318_s16  ;;  %p324_p13 = scmp.lt.s32.totalorder %s318_s16, %s318_s16 }
  0x1e   :  { %p325_p0 = por %p324_p13, %p323_p12 }
  0x20   :  { %p326_p1 = pnand %p325_p0, %p319_p11 }
  0x22   :  { %329 = shalt.err (!%p326_p1)
}
  0x23   :  { %s408_s1 = smov 64   ;;  %s409_s17 = smov 4  }
  0x24   :  { %25 = dma.hbm_to_vmem [thread:$0]  %s525_s0, 256, %s20_s8, [#allocation4], %s408_s1, %s408_s1, %s409_s17  }
  0x25   :  { %s410_s20 = smov [#allocation8]   ;;  %s411_s22 = smov [#allocation9]  }
  0x26   :  { %s43_s21 = sshll.u32 %s410_s20, 4  ;;  %s55_s23 = sshll.u32 %s411_s22, 4  ;;  %s44_s21 = int_to_ptr.vmem [resolvable:$true] %s43_s21  ;;  %s470_s23 = int_to_ptr.vmem [resolvable:$true] %s55_s23 }
  0x27   :  { %s330_s26 = scalar_lea.hbm %s527_s2, 512 }
  0x28   :  { %p331_p2 = scmp.ne.s32.totalorder %s527_s2, %s330_s26  ;;  %p334_p3 = scmp.lt.u32.totalorder %s330_s26, %s527_s2 }
  0x2a   :  { %p336_p4 = pnand %p334_p3, %p331_p2 }
  0x2c   :  { %339 = shalt.err (!%p336_p4)
}
  0x2d   :  { %s340_s0 = scalar_lea.vmem %s44_s21, 512  ;;  %p345_p6 = scmp.lt.s32.totalorder %s44_s21, %s44_s21 }
  0x2e   :  { %p341_p5 = scmp.ne.s32.totalorder %s44_s21, %s340_s0  ;;  %p346_p7 = scmp.lt.s32.totalorder %s340_s0, %s340_s0 }
  0x30   :  { %p347_p8 = por %p346_p7, %p345_p6 }
  0x32   :  { %p348_p9 = pnand %p347_p8, %p341_p5 }
  0x34   :  { %351 = shalt.err (!%p348_p9)
}
  0x35   :  { %49 = dma.hbm_to_vmem [thread:$0]  %s527_s2, 512, %s44_s21, [#allocation7], %s405_s28, %s405_s28, %s406_s29  }
  0x36   :  { %s352_s12 = scalar_lea.hbm %s528_s3, 512 }
  0x37   :  { %p353_p10 = scmp.ne.s32.totalorder %s528_s3, %s352_s12  ;;  %p356_p11 = scmp.lt.u32.totalorder %s352_s12, %s528_s3 }
  0x39   :  { %p358_p12 = pnand %p356_p11, %p353_p10 }
  0x3b   :  { %361 = shalt.err (!%p358_p12)
}
  0x3c   :  { %s362_s1 = scalar_lea.vmem %s470_s23, 512  ;;  %p367_p0 = scmp.lt.s32.totalorder %s470_s23, %s470_s23 }
  0x3d   :  { %p363_p13 = scmp.ne.s32.totalorder %s470_s23, %s362_s1  ;;  %p368_p1 = scmp.lt.s32.totalorder %s362_s1, %s362_s1 }
  0x3f   :  { %p369_p2 = por %p368_p1, %p367_p0 }
  0x41   :  { %p370_p3 = pnand %p369_p2, %p363_p13 }
  0x43   :  { %373 = shalt.err (!%p370_p3)
}
  0x44   :  { %61 = dma.hbm_to_vmem [thread:$0]  %s528_s3, 512, %s470_s23, [#allocation10], %s405_s28, %s405_s28, %s406_s29  }
  0x45   :  { %396 = dma.done.wait [#allocation4], 256  }
  0x46   :  { %397 = vsyncadd [#allocation4], 4294967040 }
  0x47   :  { %398 = dma.done.wait [#allocation7], 1024  }
  0x48   :  { %399 = vsyncadd [#allocation7], 4294966272 }
  0x49   :  { %400 = dma.done.wait [#allocation10], 512  }
  0x4a   :  { %401 = vsyncadd [#allocation10], 4294966784  ;;  %v85_v0 = vld [vmem:[#allocation6] sm:$0xff]  ;;  %v86_v3 = vld [vmem:[#allocation6 + $0x8] sm:$0xff] }
  0x4b   :  { %v89_v1 = vunpack.c.l.s8.bf16 %v85_v0  ;;  %v90_v2 = vunpack.c.h.s8.bf16 %v85_v0  ;;  %v284_v4 = vld [vmem:[#allocation3] sm:$0xff]   ;;  %v91_v5 = vunpack.c.l.s8.bf16 %v86_v3  ;;  %v92_v6 = vunpack.c.h.s8.bf16 %v86_v3  ;;  %v88_v10 = vld [vmem:[#allocation6 + $0x18] sm:$0xff]  ;;  %v181_v17 = vld [vmem:[#allocation8] sm:$0xff] }
  0x4c   :  { %271 = vmatprep.mubr.bf16.mxu0 %v284_v4  ;;  %v87_v7 = vld [vmem:[#allocation6 + $0x10] sm:$0xff]  ;;  %v95_v11 = vunpack.c.l.s8.bf16 %v88_v10  ;;  %v96_v12 = vunpack.c.h.s8.bf16 %v88_v10  ;;  %v285_v13 = vld [vmem:[#allocation3 + $0x8] sm:$0xff]   ;;  %v195_v18 = vld [vmem:[#allocation9] sm:$0xff] }
  0x4d   :  { %255 = vmatprep.subr.bf16.mxu0 %v89_v1  ;;  %v93_v8 = vunpack.c.l.s8.bf16 %v87_v7  ;;  %v94_v9 = vunpack.c.h.s8.bf16 %v87_v7  ;;  %v244_v14 = vld [vmem:[%s529_s4] ss:$0 sm:$0xff]  ;;  %v184_v19 = vld [vmem:[#allocation8 + $0x18] sm:$0xff]  ;;  %v182_v23 = vld [vmem:[#allocation8 + $0x8] sm:$0xff]  ;;  %v199_v26 = vmul.f32 0.5, %v195_v18  ;;  %s412_s4 = smov [#allocation11]  }
  0x4e   :  { %256 = vmatpush3.bf16.msra.mxu0 %v89_v1  ;;  %v183_v15 = vld [vmem:[#allocation8 + $0x10] sm:$0xff]  ;;  %v198_v20 = vld [vmem:[#allocation9 + $0x18] sm:$0xff]  ;;  %v196_v24 = vld [vmem:[#allocation9 + $0x8] sm:$0xff]  ;;  %v191_v25 = vmul.f32 %v244_v14, %v181_v17  ;;  %v194_v27 = vmul.f32 %v244_v14, %v184_v19  ;;  %v192_v29 = vmul.f32 %v244_v14, %v182_v23  ;;  %s228_s19 = sshll.u32 %s412_s4, 4  ;;  %s229_s19 = int_to_ptr.vmem [resolvable:$true] %s228_s19 }
  0x4f   :  { %257 = vmatprep.subr.bf16.mxu0 %v90_v2  ;;  %v197_v16 = vld [vmem:[#allocation9 + $0x10] sm:$0xff]  ;;  %v193_v21 = vmul.f32 %v244_v14, %v183_v15  ;;  %v202_v28 = vmul.f32 0.5, %v198_v20  ;;  %v200_v30 = vmul.f32 0.5, %v196_v24  ;;  %s374_s20 = scalar_lea.vmem %s229_s19, 512  ;;  %p379_p5 = scmp.lt.s32.totalorder %s229_s19, %s229_s19 }
  0x50   :  { %v201_v22 = vmul.f32 0.5, %v197_v16  ;;  %v203_v33 = vadd.f32 %v199_v26, %v191_v25  ;;  %p375_p4 = scmp.ne.s32.totalorder %s229_s19, %s374_s20  ;;  %p380_p6 = scmp.lt.s32.totalorder %s374_s20, %s374_s20 }
  0x51   :  { %v206_v36 = vadd.f32 %v202_v28, %v194_v27  ;;  %v204_v39 = vadd.f32 %v200_v30, %v192_v29 }
  0x52   :  { %258 = vmatpush3.bf16.msra.mxu0 %v90_v2  ;;  %v205_v31 = vadd.f32 %v201_v22, %v193_v21  ;;  %p381_p7 = por %p380_p6, %p379_p5 }
  0x53   :  { %259 = vmatprep.subr.bf16.mxu0 %v91_v5 }
  0x54   :  { %p382_p8 = pnand %p381_p7, %p375_p4 }
  0x56   :  { %260 = vmatpush3.bf16.msra.mxu0 %v91_v5 }
  0x57   :  { %261 = vmatprep.subr.bf16.mxu0 %v92_v6 }
  0x5a   :  { %262 = vmatpush3.bf16.msra.mxu0 %v92_v6 }
  0x5b   :  { %263 = vmatprep.subr.bf16.mxu0 %v93_v8 }
  0x5e   :  { %264 = vmatpush3.bf16.msra.mxu0 %v93_v8 }
  0x5f   :  { %265 = vmatprep.subr.bf16.mxu0 %v94_v9 }
  0x62   :  { %266 = vmatpush3.bf16.msra.mxu0 %v94_v9 }
  0x63   :  { %267 = vmatprep.subr.bf16.mxu0 %v95_v11 }
  0x66   :  { %268 = vmatpush3.bf16.msra.mxu0 %v95_v11 }
  0x67   :  { %269 = vmatprep.subr.bf16.mxu0 %v96_v12 }
  0x6a   :  { %270 = vmatpush3.bf16.msra.mxu0 %v96_v12 }
  0x6d   :  { %272 = vmatmul.mubr.bf16.vlgmr.msra.gmra.mrb[0].mxu0 %v285_v13 }
 0x140   :  { %v273_v32 = vpop.f32.mrb[0].mxu0 }
 0x141   :  { %v213_v34 = vmul.f32 0.5, %v273_v32  ;;  %v154_v35 = vpop.f32.mrb[1].mxu0 }
 0x142   :  { %v211_v37 = vmul.f32 0.5, %v154_v35  ;;  %v274_v38 = vpop.f32.mrb[2].mxu0 }
 0x143   :  { %v217_v40 = vadd.f32 %v213_v34, %v205_v31  ;;  %v214_v41 = vmul.f32 0.5, %v274_v38  ;;  %v157_v42 = vpop.f32.mrb[3].mxu0 }
 0x144   :  { %v215_v43 = vadd.f32 %v211_v37, %v203_v33  ;;  %v212_v44 = vmul.f32 0.5, %v157_v42 }
 0x145   :  { %221 = vst [vmem:[#allocation11 + $0x10] sm:$0xff] %v217_v40  ;;  %v218_v45 = vadd.f32 %v214_v41, %v206_v36 }
 0x146   :  { %219 = vst [vmem:[#allocation11] sm:$0xff] %v215_v43  ;;  %v216_v46 = vadd.f32 %v212_v44, %v204_v39 }
 0x147   :  { %222 = vst [vmem:[#allocation11 + $0x18] sm:$0xff] %v218_v45 }
 0x148   :  { %220 = vst [vmem:[#allocation11 + $0x8] sm:$0xff] %v216_v46 }
 0x149   :  { %385 = shalt.err (!%p382_p8)
}
 0x14a   :  { %s386_s23 = scalar_lea.hbm %s530_s5, 512 }
 0x14b   :  { %p387_p9 = scmp.ne.s32.totalorder %s530_s5, %s386_s23  ;;  %p390_p10 = scmp.lt.u32.totalorder %s386_s23, %s530_s5 }
 0x14d   :  { %p392_p11 = pnand %p390_p10, %p387_p9 }
 0x14f   :  { %395 = shalt.err (!%p392_p11)
}
 0x150   :  { %234 = dma.vmem_to_hbm [thread:$0]  %s229_s19, 512, %s530_s5, [#allocation5], %s405_s28, %s405_s28, %s406_s29  }
 0x151   :  { %402 = dma.done.wait [#allocation5], 512  }
 0x152   :  { %403 = vsyncadd [#allocation5], 4294966784 }
 0x153   :  { %238 = vsyncpa [#allocation4], 1 }
 0x154   :  { %239 = vsyncpa [#allocation7], 1 }
 0x155   :  { %240 = vsyncpa [#allocation10], 1 }
 0x156   :  { %241 = vsyncpa [#allocation5], 1 }

</bundles_post_ra>
